<compile_context>
chip_gen: v5e
topology: v5e:2x2
jax: 0.10.0
libtpu: 0.0.40
codegen_flags: <defaults>
</compile_context>

<pallas_src>
import math

import jax
import jax.numpy as jnp
from jax import lax
from jax.experimental import pallas as pl
from jax.experimental.pallas import tpu as pltpu


_INV_SQRT2 = 1.0 / math.sqrt(2.0)


def _round_up(x, m):
    return ((x + m - 1) // m) * m


def _cdiv(a, b):
    return -(-a // b)


def _gelu_exact(x):
    # PyTorch nn.GELU default is the exact (erf-based) GELU; keep it in f32
    # (EUP/VPU slots, effectively hidden under the MXU).
    return 0.5 * x * (1.0 + lax.erf(x * _INV_SQRT2))


def _vmem_capacity_bytes():
    """Physical VMEM per TensorCore (64 MiB on v7x, 128 MiB on v5e/v6e)."""
    try:
        info = pltpu.get_tpu_info()
        cap = int(getattr(info, "vmem_capacity_bytes", 0) or 0)
        if cap > 0:
            return cap
    except Exception:
        pass
    return 64 * 1024 * 1024  # conservative fallback (v7x-sized)


# -----------------------------------------------------------------------------
# Kernels
# -----------------------------------------------------------------------------

def _mlp_kernel_resident(x_ref, w1_ref, b1_ref, w2_ref, b2_ref, o_ref):
    """Fused fc1 -> GELU -> fc2 for one token tile; weights VMEM-resident.

    All weight/bias block indices are constant across the 1-D grid, so Pallas
    fetches them from HBM once and reuses the buffers for every token tile.
    """
    h = jnp.dot(x_ref[...], w1_ref[...], preferred_element_type=jnp.float32)
    h = _gelu_exact(h + b1_ref[...])          # f32 bias + exact erf-GELU
    # dropout(p=0.0) is the identity in train and eval -> no-op.
    y = jnp.dot(h.astype(w2_ref.dtype), w2_ref[...],
                preferred_element_type=jnp.float32)
    o_ref[...] = (y + b2_ref[...]).astype(o_ref.dtype)


def _mlp_kernel_streamed(x_ref, w1_ref, b1_ref, w2_ref, b2_ref, o_ref, acc_ref):
    """fc1 -> GELU -> fc2 with the hidden dim streamed on grid axis 1.

    grid = (n_token_tiles, n_hidden_tiles); the hidden axis is a reduction:
    fc2 partial products accumulate into an f32 VMEM scratch, finalized (+b2)
    on the last hidden step.
    """
    k = pl.program_id(1)

    @pl.when(k == 0)
    def _():
        acc_ref[...] = jnp.zeros_like(acc_ref)

    h = jnp.dot(x_ref[...], w1_ref[...], preferred_element_type=jnp.float32)
    h = _gelu_exact(h + b1_ref[...])
    acc_ref[...] += jnp.dot(h.astype(w2_ref.dtype), w2_ref[...],
                            preferred_element_type=jnp.float32)

    @pl.when(k == pl.num_programs(1) - 1)
    def _():
        o_ref[...] = (acc_ref[...] + b2_ref[...]).astype(o_ref.dtype)


# -----------------------------------------------------------------------------
# Parameter preparation (one-time, hoisted out of the per-call path)
# -----------------------------------------------------------------------------

def prepare_mlp_params(w1, b1, w2, b2, compute_dtype=jnp.bfloat16):
    """Pad feature dims to multiples of 128 and cast weights to the MXU dtype.

    Call once at parameter init; `mlp_forward_prepared` then runs without any
    per-call weight pad/cast passes over HBM.  Weights are stored transposed
    vs nn.Linear, i.e. (in, out), so the kernel computes plain x @ W + b.
    """
    C_in, C_hid = w1.shape
    C_hid2, C_out = w2.shape
    assert C_hid2 == C_hid, "w2 must be (hidden, out)"
    C_in_p = _round_up(C_in, 128)
    C_hid_p = _round_up(C_hid, 128)
    C_out_p = _round_up(C_out, 128)

    def pad2(a, shape, dtype):
        a = a.astype(dtype)
        if a.shape == shape:
            return a
        return jnp.zeros(shape, dtype).at[:a.shape[0], :a.shape[1]].set(a)

    return {
        "w1": pad2(w1, (C_in_p, C_hid_p), compute_dtype),
        "w2": pad2(w2, (C_hid_p, C_out_p), compute_dtype),
        "b1": pad2(b1.reshape(1, C_hid), (1, C_hid_p), jnp.float32),
        "b2": pad2(b2.reshape(1, C_out), (1, C_out_p), jnp.float32),
        "dims": (C_in, C_hid, C_out),
        "pads": (C_in_p, C_hid_p, C_out_p),
        "compute_dtype": compute_dtype,
    }


# -----------------------------------------------------------------------------
# Tiling selection under a per-generation VMEM budget
# -----------------------------------------------------------------------------

def _choose_tiling(M, C_in_p, C_hid_p, C_out_p, csize, osize,
                   token_tile, max_hidden_tile, budget):
    """Pick (tm, M_pad, th, resident) under a VMEM byte budget.

    Prefers th == C_hid_p ("resident": both weight matrices fetched from HBM
    exactly once).  Otherwise streams the hidden dim with the largest
    128-multiple th that divides C_hid_p (so no hidden over-padding).
    """
    max_th = C_hid_p if max_hidden_tile is None else min(
        C_hid_p, _round_up(max_hidden_tile, 128))

    def vmem_usage(tm, th, resident):
        u = (2 * tm * C_in_p * csize          # x tile (double buffered)
             + 2 * C_in_p * th * csize        # W1 block
             + 2 * 8 * th * 4                 # b1 block (f32, 8-sublane pad)
             + 2 * th * C_out_p * csize       # W2 block
             + 2 * 8 * C_out_p * 4            # b2
             + 2 * tm * C_out_p * osize       # out tile
             + tm * th * (4 + csize))         # h intermediate (f32 + bf16)
        if not resident:
            u += tm * C_out_p * 4             # f32 accumulator scratch
        return u

    tt = max(8, token_tile)
    while True:
        n_i = max(1, _cdiv(M, tt))
        if n_i < 2 and M > 8:
            n_i = 2          # >= 2 parallel token tiles for v7x megacore
        tm = _round_up(_cdiv(M, n_i), 8)      # equalized tiles -> low padding
        M_pad = n_i * tm

        if max_th == C_hid_p and vmem_usage(tm, C_hid_p, True) <= budget:
            return tm, M_pad, C_hid_p, True

        for cand in range(max_th, 127, -128):
            if C_hid_p % cand == 0 and vmem_usage(tm, cand, False) <= budget:
                return tm, M_pad, cand, False

        if tt <= 8:
            return tm, M_pad, 128, False      # best effort
        tt //= 2


# -----------------------------------------------------------------------------
# Forward
# -----------------------------------------------------------------------------

def mlp_forward_prepared(x, params, *, token_tile=512, max_hidden_tile=None):
    """x: (B, N, C_in); params from prepare_mlp_params. Returns (B, N, C_out)."""
    C_in, C_hid, C_out = params["dims"]
    C_in_p, C_hid_p, C_out_p = params["pads"]
    cdt = params["compute_dtype"]
    w1p, b1p, w2p, b2p = params["w1"], params["b1"], params["w2"], params["b2"]

    B, N, _ = x.shape
    M = B * N
    out_dtype = x.dtype
    csize = jnp.dtype(cdt).itemsize
    osize = jnp.dtype(out_dtype).itemsize

    capacity = _vmem_capacity_bytes()
    budget = int(capacity * 0.70)     # tile-fit budget (compiler headroom)
    vmem_limit = int(capacity * 0.85)  # always below physical VMEM (v7x-safe)

    tm, M_pad, th, resident = _choose_tiling(
        M, C_in_p, C_hid_p, C_out_p, csize, osize,
        token_tile, max_hidden_tile, budget)
    n_i = M_pad // tm
    n_k = C_hid_p // th

    # Pad / cast activations only when actually needed.
    x2d = x.reshape(M, C_in).astype(cdt)
    if M_pad != M or C_in_p != C_in:
        x2d = jnp.zeros((M_pad, C_in_p), cdt).at[:M, :C_in].set(x2d)

    weight_bytes = (w1p.size + w2p.size) * csize
    restream = 1 if resident else n_i          # actual weight DMA factor
    cost = pl.CostEstimate(
        flops=2 * M_pad * C_in_p * C_hid_p + 2 * M_pad * C_hid_p * C_out_p,
        transcendentals=M_pad * C_hid_p,
        bytes_accessed=(M_pad * C_in_p * csize
                        + restream * weight_bytes
                        + b1p.size * 4 + b2p.size * 4
                        + M_pad * C_out_p * osize),
    )

    if resident:
        out = pl.pallas_call(
            _mlp_kernel_resident,
            out_shape=jax.ShapeDtypeStruct((M_pad, C_out_p), out_dtype),
            grid=(n_i,),
            in_specs=[
                pl.BlockSpec((tm, C_in_p), lambda i: (i, 0)),        # x tile
                pl.BlockSpec((C_in_p, C_hid_p), lambda i: (0, 0)),   # W1 (resident)
                pl.BlockSpec((1, C_hid_p), lambda i: (0, 0)),        # b1
                pl.BlockSpec((C_hid_p, C_out_p), lambda i: (0, 0)),  # W2 (resident)
                pl.BlockSpec((1, C_out_p), lambda i: (0, 0)),        # b2
            ],
            out_specs=pl.BlockSpec((tm, C_out_p), lambda i: (i, 0)),
            compiler_params=pltpu.CompilerParams(
                dimension_semantics=("parallel",),
                vmem_limit_bytes=vmem_limit),
            cost_estimate=cost,
        )(x2d, w1p, b1p, w2p, b2p)
    else:
        out = pl.pallas_call(
            _mlp_kernel_streamed,
            out_shape=jax.ShapeDtypeStruct((M_pad, C_out_p), out_dtype),
            grid=(n_i, n_k),
            in_specs=[
                pl.BlockSpec((tm, C_in_p), lambda i, k: (i, 0)),     # x tile
                pl.BlockSpec((C_in_p, th), lambda i, k: (0, k)),     # W1 slice
                pl.BlockSpec((1, th), lambda i, k: (0, k)),          # b1 slice
                pl.BlockSpec((th, C_out_p), lambda i, k: (k, 0)),    # W2 slice
                pl.BlockSpec((1, C_out_p), lambda i, k: (0, 0)),     # b2
            ],
            out_specs=pl.BlockSpec((tm, C_out_p), lambda i, k: (i, 0)),
            scratch_shapes=[pltpu.VMEM((tm, C_out_p), jnp.float32)],
            compiler_params=pltpu.CompilerParams(
                dimension_semantics=("parallel", "arbitrary"),
                vmem_limit_bytes=vmem_limit),
            cost_estimate=cost,
        )(x2d, w1p, b1p, w2p, b2p)

    return out[:M, :C_out].reshape(B, N, C_out)


def mlp_forward(x, w1, b1, w2, b2, *, token_tile=512, max_hidden_tile=None,
                compute_dtype=jnp.bfloat16):
    """Convenience wrapper: pads/casts parameters per call.  Prefer calling
    prepare_mlp_params once and mlp_forward_prepared per step."""
    params = prepare_mlp_params(w1, b1, w2, b2, compute_dtype)
    return mlp_forward_prepared(x, params, token_tile=token_tile,
                                max_hidden_tile=max_hidden_tile)


def _reference(x, w1, b1, w2, b2):
    h = jnp.einsum("bnc,ch->bnh", x, w1) + b1
    h = jax.nn.gelu(h, approximate=False)
    return jnp.einsum("bnh,ho->bno", h, w2) + b2


if __name__ == "__main__":
    key = jax.random.PRNGKey(0)
    B, N = 2, 8
    in_features, hidden_features, out_features = 48, 200, 40

    k_x, k_w1, k_b1, k_w2, k_b2 = jax.random.split(key, 5)
    x = jax.random.normal(k_x, (B, N, in_features), dtype=jnp.float32)

    # Deterministic synthetic parameters, stored transposed as (in, out) so the
    # kernel computes plain x @ W + b (matches nn.Linear semantics).
    w1 = jax.random.normal(k_w1, (in_features, hidden_features),
                           dtype=jnp.float32) * (1.0 / math.sqrt(in_features))
    b1 = jax.random.normal(k_b1, (hidden_features,), dtype=jnp.float32) * 0.01
    w2 = jax.random.normal(k_w2, (hidden_features, out_features),
                           dtype=jnp.float32) * (1.0 / math.sqrt(hidden_features))
    b2 = jax.random.normal(k_b2, (out_features,), dtype=jnp.float32) * 0.01

    # One-time parameter prep (pad to 128 multiples + bf16 cast).
    params = prepare_mlp_params(w1, b1, w2, b2)
    y_ref = _reference(x, w1, b1, w2, b2)

    # Path 1 (default): weights fully VMEM-resident, single fused pass.
    y = jax.block_until_ready(mlp_forward_prepared(x, params))
    assert y.shape == (B, N, out_features)
    assert y.dtype == x.dtype
    # bf16 matmul inputs with f32 accumulation -> loosen tolerance vs f32 ref.
    assert jnp.allclose(y, y_ref, atol=5e-2, rtol=5e-2), "resident path mismatch"

    # Path 2: hidden-dim streaming path (exercised by capping the hidden tile).
    y_s = jax.block_until_ready(
        mlp_forward_prepared(x, params, max_hidden_tile=128))
    assert jnp.allclose(y_s, y_ref, atol=5e-2, rtol=5e-2), "streamed path mismatch"

    print("KERNEL_OK")
</pallas_src>

<mosaic_0001>
module attributes {stable_mosaic.version = 11 : i64} {
  func.func @_mlp_kernel_resident(%arg0: i32, %arg1: memref<8x128xbf16, #tpu.memory_space<vmem>>, %arg2: memref<128x256xbf16, #tpu.memory_space<vmem>>, %arg3: memref<1x256xf32, #tpu.memory_space<vmem>>, %arg4: memref<256x128xbf16, #tpu.memory_space<vmem>>, %arg5: memref<1x128xf32, #tpu.memory_space<vmem>>, %arg6: memref<8x128xf32, #tpu.memory_space<vmem>>) attributes {dimension_semantics = [#tpu.dimension_semantics<parallel>], iteration_bounds = array<i64: 2>, scalar_prefetch = 0 : i64, scratch_operands = 0 : i64, tpu.core_type = #tpu.core_type<tc>, window_params = [{transform_indices = @transform_0, window_bounds = array<i64: 8, 128>}, {pipeline_mode = #tpu.pipeline_mode<synchronous>, transform_indices = @transform_1, window_bounds = array<i64: 128, 256>}, {pipeline_mode = #tpu.pipeline_mode<synchronous>, transform_indices = @transform_2, window_bounds = array<i64: 1, 256>}, {pipeline_mode = #tpu.pipeline_mode<synchronous>, transform_indices = @transform_3, window_bounds = array<i64: 256, 128>}, {pipeline_mode = #tpu.pipeline_mode<synchronous>, transform_indices = @transform_4, window_bounds = array<i64: 1, 128>}, {transform_indices = @transform_5, window_bounds = array<i64: 8, 128>}]} {
    %c0 = arith.constant 0 : index
    %c0_0 = arith.constant 0 : index
    %0 = vector.load %arg1[%c0, %c0_0] : memref<8x128xbf16, #tpu.memory_space<vmem>>, vector<8x128xbf16>
    %c0_1 = arith.constant 0 : index
    %c0_2 = arith.constant 0 : index
    %1 = vector.load %arg2[%c0_1, %c0_2] : memref<128x256xbf16, #tpu.memory_space<vmem>>, vector<128x256xbf16>
    %cst = arith.constant dense<0.000000e+00> : vector<8x256xf32>
    %2 = tpu.matmul %0, %1, %cst {dimension_numbers = #tpu.dot_dimension_numbers<[1], [0], [0], [1], [0, 0, 1, 1], [], []>} : vector<8x128xbf16>, vector<128x256xbf16>, vector<8x256xf32> -> vector<8x256xf32>
    %c0_3 = arith.constant 0 : index
    %c0_4 = arith.constant 0 : index
    %3 = vector.load %arg3[%c0_3, %c0_4] : memref<1x256xf32, #tpu.memory_space<vmem>>, vector<1x256xf32>
    %4 = vector.broadcast %3 : vector<1x256xf32> to vector<8x256xf32>
    %5 = arith.addf %2, %4 : vector<8x256xf32>
    %cst_5 = arith.constant 5.000000e-01 : f32
    %6 = vector.broadcast %cst_5 : f32 to vector<8x256xf32>
    %7 = arith.mulf %6, %5 : vector<8x256xf32>
    %cst_6 = arith.constant 0.707106769 : f32
    %8 = vector.broadcast %cst_6 : f32 to vector<8x256xf32>
    %9 = arith.mulf %5, %8 : vector<8x256xf32>
    %10 = math.erf %9 : vector<8x256xf32>
    %cst_7 = arith.constant 1.000000e+00 : f32
    %11 = vector.broadcast %cst_7 : f32 to vector<8x256xf32>
    %12 = arith.addf %11, %10 : vector<8x256xf32>
    %13 = arith.mulf %7, %12 : vector<8x256xf32>
    %14 = arith.truncf %13 : vector<8x256xf32> to vector<8x256xbf16>
    %c0_8 = arith.constant 0 : index
    %c0_9 = arith.constant 0 : index
    %15 = vector.load %arg4[%c0_8, %c0_9] : memref<256x128xbf16, #tpu.memory_space<vmem>>, vector<256x128xbf16>
    %cst_10 = arith.constant dense<0.000000e+00> : vector<8x128xf32>
    %16 = tpu.matmul %14, %15, %cst_10 {dimension_numbers = #tpu.dot_dimension_numbers<[1], [0], [0], [1], [0, 0, 1, 1], [], []>} : vector<8x256xbf16>, vector<256x128xbf16>, vector<8x128xf32> -> vector<8x128xf32>
    %c0_11 = arith.constant 0 : index
    %c0_12 = arith.constant 0 : index
    %17 = vector.load %arg5[%c0_11, %c0_12] : memref<1x128xf32, #tpu.memory_space<vmem>>, vector<1x128xf32>
    %18 = vector.broadcast %17 : vector<1x128xf32> to vector<8x128xf32>
    %19 = arith.addf %16, %18 : vector<8x128xf32>
    %c0_13 = arith.constant 0 : index
    %c0_14 = arith.constant 0 : index
    %20 = vector.load %arg6[%c0_13, %c0_14] : memref<8x128xf32, #tpu.memory_space<vmem>>, vector<8x128xf32>
    tpu.vector_store %arg6[%c0_13, %c0_14], %19 {strides = array<i32>} : memref<8x128xf32, #tpu.memory_space<vmem>>, vector<8x128xf32>,
    return
  }
  func.func @transform_0(%arg0: i32) -> (i32, i32) {
    %c0_i32 = arith.constant 0 : i32
    %c0_i32_0 = arith.constant 0 : i32
    return %arg0, %c0_i32 : i32, i32
  }
  func.func @transform_1(%arg0: i32) -> (i32, i32) {
    %c0_i32 = arith.constant 0 : i32
    %c0_i32_0 = arith.constant 0 : i32
    %c0_i32_1 = arith.constant 0 : i32
    return %c0_i32, %c0_i32_0 : i32, i32
  }
  func.func @transform_2(%arg0: i32) -> (i32, i32) {
    %c0_i32 = arith.constant 0 : i32
    %c0_i32_0 = arith.constant 0 : i32
    %c0_i32_1 = arith.constant 0 : i32
    return %c0_i32, %c0_i32_0 : i32, i32
  }
  func.func @transform_3(%arg0: i32) -> (i32, i32) {
    %c0_i32 = arith.constant 0 : i32
    %c0_i32_0 = arith.constant 0 : i32
    %c0_i32_1 = arith.constant 0 : i32
    return %c0_i32, %c0_i32_0 : i32, i32
  }
  func.func @transform_4(%arg0: i32) -> (i32, i32) {
    %c0_i32 = arith.constant 0 : i32
    %c0_i32_0 = arith.constant 0 : i32
    %c0_i32_1 = arith.constant 0 : i32
    return %c0_i32, %c0_i32_0 : i32, i32
  }
  func.func @transform_5(%arg0: i32) -> (i32, i32) {
    %c0_i32 = arith.constant 0 : i32
    %c0_i32_0 = arith.constant 0 : i32
    return %arg0, %c0_i32 : i32, i32
  }
}

</mosaic_0001>

<bundles_post_ra>
// kernel: tpu_custom_call.1
= control target key start
LH: loop header
LB: loop body
LE: loop exit
PB: predicated region body
PF: predicated region fallthrough
CT: control target
= control target key end

     0   :  { %10 = vsyncpa [#allocation3], 0  ;;  %s1463_s0 = inlined_call_operand.hbm [shape: bf16[16,128], index: 0, kind: input, shape index: {}]   ;;  %s1464_s1 = inlined_call_operand.hbm [shape: bf16[128,256], index: 1, kind: input, shape index: {}]   ;;  %s1465_s2 = inlined_call_operand.hbm [shape: f32[1,256], index: 2, kind: input, shape index: {}]   ;;  %s1466_s3 = inlined_call_operand.hbm [shape: bf16[256,128], index: 3, kind: input, shape index: {}]   ;;  %s1467_s4 = inlined_call_operand.vmem [shape: f32[1,128], index: 4, kind: input, shape index: {}]   ;;  %s1468_s5 = inlined_call_operand.hbm [shape: f32[16,128], index: 5, kind: output, shape index: {}]  }
   0x1   :  { %12 = vsyncpa [#allocation3 + $0x1], 0 }
   0x2   :  { %13 = vsyncpa [#allocation6], 0 }
   0x3   :  { %14 = vsyncpa [#allocation9], 0 }
   0x4   :  { %15 = vsyncpa [#allocation4], 0 }
   0x5   :  { %17 = vsyncpa [#allocation4 + $0x1], 0  ;;  %s1282_s18 = smov 0   ;;  %s1284_s19 = smov 0  }
   0x6   :  { %s1286_s20 = smov 0   ;;  %s1288_s21 = smov 0  }
   0x7 LB: > { %s175_s24 = sshll.u32 %s1464_s1, 4  ;;  %s1306_s25 = sadd.s32 4294967295, %s1243_s21   ;;  %s1243_s21 = sphi %s1288_s21, %s1479_s21   ;;  %s1239_s20 = sphi %s1286_s20, %s1478_s20   ;;  %s1235_s19 = sphi %s1284_s19, %s1477_s19   ;;  %s1231_s18 = sphi %s1282_s18, %s1476_s18   ;;  %s176_s24 = int_to_ptr.hbm [resolvable:$true] %s175_s24 }
   0x8   : > { %p784_p0 = scmp.ge.s32.totalorder %s1243_s21, 1  ;;  %p44_p1 = scmp.eq.s32.totalorder %s1306_s25, 0 }
   0x9   : > { %p164_p2 = scmp.lt.s32.totalorder %s1243_s21, 3  ;;  %s1245_s27 = smov [#allocation5]  }
   0xa   : > { %s177_s28 = sshll.u32 %s1245_s27, 4  ;;  %s190_s6 = sshll.u32 %s1465_s2, 4  ;;  %s178_s28 = int_to_ptr.vmem [resolvable:$true] %s177_s28  ;;  %s191_s6 = int_to_ptr.hbm [resolvable:$true] %s190_s6 }
   0xb   : > { %p1311_p3 = pnand %p784_p0, %p164_p2  ;;  %s201_s10 = sshll.u32 %s1466_s3, 4  ;;  %s202_s10 = int_to_ptr.hbm [resolvable:$true] %s201_s10 }
   0xc   : > { %s1246_s11 = smov [#allocation7]   ;;  %s1247_s13 = smov 128  }
   0xd   : > { %p979_p4 = pneg %p1311_p3  ;;  %s192_s12 = sshll.u32 %s1246_s11, 4  ;;  %s193_s12 = int_to_ptr.vmem [resolvable:$true] %s192_s12 }
   0xe   : > { %s1248_s14 = smov 8   ;;  %s1249_s15 = smov [#allocation8]  }
   0xf   : > { %p1323_p6 = pnand %p979_p4, %p44_p1  ;;  %s203_s16 = sshll.u32 %s1249_s15, 4  ;;  %s204_s16 = int_to_ptr.vmem [resolvable:$true] %s203_s16 }
  0x10   : > { %s1250_s17 = smov 64   ;;  %s1251_s22 = smov 4  }
  0x11   : > { %982 = dma.hbm_to_vmem [thread:$0]  (!%p1323_p6), %s176_s24, 2048, %s178_s28, [#allocation6], %s1247_s13, %s1247_s13, %s1248_s14  }
  0x12   : > { %985 = dma.hbm_to_vmem [thread:$0]  (!%p1323_p6), %s191_s6, 32, %s193_s12, [#allocation6]  }
  0x13   : > { %988 = dma.hbm_to_vmem [thread:$0]  (!%p1323_p6), %s202_s10, 2048, %s204_s16, [#allocation9], %s1250_s17, %s1250_s17, %s1251_s22  }
  0x14   : > { %s783_s23 = sadd.s32 4294967294, %s1243_s21   ;;  %s1338_s24 = sadd.s32 1, %s1243_s21  }
  0x15   : > { %s30_s27 = sadd.s32 1, %s1239_s20  ;;  %s27_s28 = ssub.s32 %s1243_s21, %s1338_s24 }
  0x16   : > { %p37_p7 = scmp.ne.s32.totalorder %s1239_s20, %s1235_s19  ;;  %p28_p8 = scmp.eq.s32.totalorder %s27_s28, 0 }
  0x17   : > { %p38_p9 = scmp.eq.s32.totalorder %s1243_s21, 0  ;;  %p43_p10 = scmp.ne.s32.totalorder %s1235_s19, %s1231_s18 }
  0x18   : > { %p151_p11 = scmp.eq.s32.totalorder %s1306_s25, 1  ;;  %p157_p0 = scmp.eq.s32.totalorder %s783_s23, 1 }
  0x19   : > { %s1350_s29 = scalar_select %p28_p8, %s1239_s20, %s30_s27  }
  0x1a   : > { %p1354_p12 = por %p44_p1, %p43_p10  ;;  %p1358_p13 = por %p151_p11, %p37_p7 }
  0x1b   : > { %p39_p2 = por %p38_p9, %p37_p7  ;;  %s220_s7 = sand.u32 1, %s1239_s20  }
  0x1c   : > { %p1363_p4 = por %p157_p0, %p43_p10  ;;  %p1000_p6 = scmp.lt.s32.totalorder %s1243_s21, 2 }
  0x1d   : > { %s789_s9 = sshll.u32 %s220_s7, 2  ;;  %s790_s10 = sshll.u32 %s1243_s21, 2 }
  0x1e   : > { %s228_s13 = scalar_lea.hbm %s1463_s0, %s790_s10  ;;  %s224_s15 = scalar_lea.vmem [#allocation2], %s789_s9 }
  0x1f   : > { %s230_s14 = sshll.u32 %s228_s13, 4  ;;  %s232_s16 = sshll.u32 %s224_s15, 4  ;;  %s231_s14 = int_to_ptr.hbm [resolvable:$true] %s230_s14  ;;  %s233_s16 = int_to_ptr.vmem [resolvable:$true] %s232_s16 }
  0x20   : > { %p1372_p8 = pnand %p1000_p6, %p39_p2  ;;  %s221_s22 = scalar_lea.sflag [#allocation3], %s220_s7 }
  0x21   : > { %s1139_s23 = sshra.s32 %s231_s14, 4  ;;  %s1146_s9 = scalar_lea.hbm %s1463_s0, 8  ;;  %s1140_s23 = int_to_ptr.hbm [resolvable:$true] %s1139_s23 }
  0x22   : > { %s1141_s27 = scalar_lea.hbm %s1140_s23, 4  ;;  %p1143_p9 = pneg %p1372_p8 }
  0x23   : > { %p1142_p7 = scmp.ne.s32.totalorder %s1140_s23, %s1141_s27  ;;  %p1147_p0 = scmp.lt.s32.totalorder %s1140_s23, %s1463_s0 }
  0x24   : > { %p1148_p2 = scmp.lt.s32.totalorder %s1146_s9, %s1141_s27 }
  0x25   : > { %p1144_p10 = pnand %p1143_p9, %p1142_p7 }
  0x26   : > { %p1149_p6 = por %p1148_p2, %p1147_p0 }
  0x27   : > { %p1145_p11 = pneg %p1144_p10 }
  0x29   : > { %p1150_p5 = pnand %p1149_p6, %p1145_p11 }
  0x2b   : > { %1153 = shalt.err (!%p1150_p5)
}
  0x2c   : > { %992 = dma.hbm_to_vmem [thread:$0]  (!%p1372_p8), %s231_s14, 64, %s233_s16, %s221_s22  }
  0x2d   : > { %241 = sbr.rel (%p1311_p3) target bundleno = 411 (0x19b), region = 40  ;;  %s1389_s7 = sand.u32 (!%p1311_p3), 1, %s1235_s19  }
  0x2e   : > { %s792_s13 = sshll.u32 (!%p1311_p3), %s1389_s7, 2  ;;  %s244_s15 = scalar_lea.sflag (!%p1311_p3), [#allocation3], %s1389_s7 }
  0x2f   : > { %s1393_s28 = scalar_lea.vmem (!%p1311_p3), [#allocation2], %s792_s13 }
  0x32   : > { %1214 = dma.done.wait (%p1354_p12), %s244_s15, 64  }
  0x33   : > { %1216 = vsyncadd (%p1354_p12), %s244_s15, 4294967232 }
  0x34   : > { %1218 = dma.done.wait (%p44_p1), [#allocation6], 2080  }
  0x35   : > { %1220 = vsyncadd (%p44_p1), [#allocation6], 4294965216 }
  0x36   : > { %1222 = dma.done.wait (%p44_p1), [#allocation9], 2048  }
  0x37   : > { %1224 = vsyncadd (%p44_p1), [#allocation9], 4294965248  ;;  %v855_v0 = vld [vmem:[#allocation5 + $0x70] sm:$0xf]  ;;  %v946_v1 = vld [vmem:[#allocation5 + $0x74] sm:$0xf0] }
  0x38   : > { %v945_v2 = vld [vmem:[#allocation5 + $0x74] sm:$0xf]  ;;  %v856_v3 = vor.u32 %v946_v1, %v855_v0  ;;  %v857_v4 = vld [vmem:[#allocation5 + $0x78] sm:$0xf0]  ;;  %v847_v5 = vld [vmem:[#allocation5 + $0x60] sm:$0xf] }
  0x39   : > { %v944_v6 = vld [vmem:[#allocation5 + $0x64] sm:$0xf0]  ;;  %v860_v7 = vor.u32 %v945_v2, %v857_v4  ;;  %v943_v8 = vld [vmem:[#allocation5 + $0x64] sm:$0xf]  ;;  %v849_v9 = vld [vmem:[#allocation5 + $0x68] sm:$0xf0] }
  0x3a   : > { %393 = vmatpush.bf16.msra.mxu0 %v856_v3  ;;  %v848_v10 = vor.u32 %v944_v6, %v847_v5  ;;  %v852_v11 = vor.u32 %v943_v8, %v849_v9  ;;  %v839_v12 = vld [vmem:[#allocation5 + $0x50] sm:$0xf]  ;;  %v942_v13 = vld [vmem:[#allocation5 + $0x54] sm:$0xf0]  ;;  %v941_v14 = vld [vmem:[#allocation5 + $0x54] sm:$0xf] }
  0x3b   : > { %406 = vmatpush.bf16.msra.mxu1 %v860_v7  ;;  %v841_v15 = vld [vmem:[#allocation5 + $0x58] sm:$0xf0]  ;;  %v840_v16 = vor.u32 %v942_v13, %v839_v12  ;;  %v831_v18 = vld [vmem:[#allocation5 + $0x40] sm:$0xf]  ;;  %v940_v19 = vld [vmem:[#allocation5 + $0x44] sm:$0xf0] }
  0x3c   : > { %v844_v17 = vor.u32 %v941_v14, %v841_v15  ;;  %v939_v20 = vld [vmem:[#allocation5 + $0x44] sm:$0xf]  ;;  %v833_v21 = vld [vmem:[#allocation5 + $0x48] sm:$0xf0]  ;;  %v832_v22 = vor.u32 %v940_v19, %v831_v18  ;;  %v823_v24 = vld [vmem:[#allocation5 + $0x30] sm:$0xf] }
  0x3d   : > { %v836_v23 = vor.u32 %v939_v20, %v833_v21  ;;  %v938_v25 = vld [vmem:[#allocation5 + $0x34] sm:$0xf0]  ;;  %v937_v26 = vld [vmem:[#allocation5 + $0x34] sm:$0xf]  ;;  %v825_v27 = vld [vmem:[#allocation5 + $0x38] sm:$0xf0] }
  0x3e   : > { %394 = vmatpush.bf16.msra.mxu0 %v848_v10  ;;  %v824_v28 = vor.u32 %v938_v25, %v823_v24  ;;  %v828_v29 = vor.u32 %v937_v26, %v825_v27  ;;  %v815_v30 = vld [vmem:[#allocation5 + $0x20] sm:$0xf]  ;;  %v936_v31 = vld [vmem:[#allocation5 + $0x24] sm:$0xf0]  ;;  %v935_v32 = vld [vmem:[#allocation5 + $0x24] sm:$0xf] }
  0x3f   : > { %407 = vmatpush.bf16.msra.mxu1 %v852_v11  ;;  %v817_v33 = vld [vmem:[#allocation5 + $0x28] sm:$0xf0]  ;;  %v816_v34 = vor.u32 %v936_v31, %v815_v30  ;;  %v807_v36 = vld [vmem:[#allocation5 + $0x10] sm:$0xf]  ;;  %v934_v37 = vld [vmem:[#allocation5 + $0x14] sm:$0xf0] }
  0x40   : > { %v820_v35 = vor.u32 %v935_v32, %v817_v33  ;;  %v933_v38 = vld [vmem:[#allocation5 + $0x14] sm:$0xf]  ;;  %v809_v39 = vld [vmem:[#allocation5 + $0x18] sm:$0xf0]  ;;  %v808_v40 = vor.u32 %v934_v37, %v807_v36  ;;  %v799_v42 = vld [vmem:[#allocation5] sm:$0xf] }
  0x41   : > { %v812_v41 = vor.u32 %v933_v38, %v809_v39  ;;  %v932_v43 = vld [vmem:[#allocation5 + $0x4] sm:$0xf0]  ;;  %v931_v44 = vld [vmem:[#allocation5 + $0x4] sm:$0xf]  ;;  %v801_v45 = vld [vmem:[#allocation5 + $0x8] sm:$0xf0] }
  0x42   : > { %395 = vmatpush.bf16.msra.mxu0 %v840_v16  ;;  %v800_v46 = vor.u32 %v932_v43, %v799_v42  ;;  %v804_v47 = vor.u32 %v931_v44, %v801_v45  ;;  %v290_v48 = vld [vmem:[%s1393_s28] sm:$0xf]  ;;  %v307_v51 = vld [vmem:[#allocation7] sm:$0x3]  ;;  %v952_v56 = vld [vmem:[#allocation8 + $0x28] sm:$0xff]  ;;  %s796_s26 = sshll.u32 %s1389_s7, 3 }
  0x43   : > { %408 = vmatpush.bf16.msra.mxu1 %v844_v17  ;;  %v954_v49 = vld [vmem:[#allocation8 + $0x38] sm:$0xff]  ;;  %v953_v52 = vld [vmem:[#allocation8 + $0x30] sm:$0xff]  ;;  %v309_v54 = vperm.slane %v307_v51, 0  ;;  %v310_v55 = vperm.slane %v307_v51, 1  ;;  %v960_v57 = vld [vmem:[#allocation8 + $0x68] sm:$0xff]  ;;  %s928_s30 = sshll.u32 %s1306_s25, 3 }
  0x44   : > { %v962_v50 = vld [vmem:[#allocation8 + $0x78] sm:$0xff]  ;;  %641 = vmatpush.bf16.msra.mxu2 %v954_v49  ;;  %v961_v53 = vld [vmem:[#allocation8 + $0x70] sm:$0xff]  ;;  %v951_v62 = vld [vmem:[#allocation8 + $0x20] sm:$0xff]  ;;  %s679_s23 = scalar_lea.hbm %s1468_s5, %s928_s30  ;;  %s289_s27 = scalar_lea.vmem [#allocation10], %s796_s26 }
  0x45   : > { %654 = vmatpush.bf16.msra.mxu3 %v962_v50  ;;  %v959_v63 = vld [vmem:[#allocation8 + $0x60] sm:$0xff]  ;;  %v950_v4 = vld [vmem:[#allocation8 + $0x18] sm:$0xff]  ;;  %v949_v13 = vld [vmem:[#allocation8 + $0x10] sm:$0xff]  ;;  %s681_s10 = sshll.u32 %s289_s27, 4  ;;  %s683_s9 = sshll.u32 %s679_s23, 4  ;;  %s682_s10 = int_to_ptr.vmem [resolvable:$true] %s681_s10  ;;  %s684_s9 = int_to_ptr.hbm [resolvable:$true] %s683_s9 }
  0x46   : > { %396 = vmatpush.bf16.msra.mxu0 %v832_v22  ;;  %v958_v5 = vld [vmem:[#allocation8 + $0x58] sm:$0xff]  ;;  %v957_v14 = vld [vmem:[#allocation8 + $0x50] sm:$0xff]  ;;  %v956_v24 = vld [vmem:[#allocation8 + $0x48] sm:$0xff]  ;;  %s669_s25 = scalar_lea.sflag [#allocation4], %s1389_s7  ;;  %s1183_s11 = sshra.s32 %s684_s9, 4  ;;  %s1184_s11 = int_to_ptr.hbm [resolvable:$true] %s1183_s11 }
  0x47   : > { %409 = vmatpush.bf16.msra.mxu1 %v836_v23  ;;  %v948_v23 = vld [vmem:[#allocation8 + $0x8] sm:$0xff]  ;;  %v947_v31 = vld [vmem:[#allocation8] sm:$0xff]  ;;  %s1185_s12 = scalar_lea.hbm %s1184_s11, 8  ;;  %s1189_s28 = scalar_lea.hbm %s1468_s5, 16 }
  0x48   : > { %642 = vmatpush.bf16.msra.mxu2 %v953_v52  ;;  %v955_v32 = vld [vmem:[#allocation8 + $0x40] sm:$0xff]  ;;  %p1186_p1 = scmp.ne.s32.totalorder %s1184_s11, %s1185_s12  ;;  %p1190_p12 = scmp.lt.s32.totalorder %s1184_s11, %s1468_s5 }
  0x49   : > { %655 = vmatpush.bf16.msra.mxu3 %v961_v53  ;;  %p1191_p8 = scmp.lt.s32.totalorder %s1189_s28, %s1185_s12 }
  0x4a   : > { %397 = vmatpush.bf16.msra.mxu0 %v824_v28  ;;  %p1187_p3 = pnand %p1186_p1, %p1358_p13 }
  0x4b   : > { %410 = vmatpush.bf16.msra.mxu1 %v828_v29  ;;  %p1192_p7 = por %p1191_p8, %p1190_p12 }
  0x4c   : > { %643 = vmatpush.bf16.msra.mxu2 %v952_v56  ;;  %p1188_p5 = pneg %p1187_p3 }
  0x4d   : > { %656 = vmatpush.bf16.msra.mxu3 %v960_v57 }
  0x4e   : > { %398 = vmatpush.bf16.msra.mxu0 %v816_v34  ;;  %p1193_p9 = pnand %p1192_p7, %p1188_p5 }
  0x4f   : > { %411 = vmatpush.bf16.msra.mxu1 %v820_v35 }
  0x50   : > { %644 = vmatpush.bf16.msra.mxu2 %v951_v62 }
  0x51   : > { %657 = vmatpush.bf16.msra.mxu3 %v959_v63 }
  0x52   : > { %399 = vmatpush.bf16.msra.mxu0 %v808_v40 }
  0x53   : > { %412 = vmatpush.bf16.msra.mxu1 %v812_v41 }
  0x54   : > { %645 = vmatpush.bf16.msra.mxu2 %v950_v4 }
  0x55   : > { %658 = vmatpush.bf16.msra.mxu3 %v958_v5 }
  0x56   : > { %400 = vmatpush.bf16.msra.mxu0 %v800_v46 }
  0x57   : > { %413 = vmatpush.bf16.msra.mxu1 %v804_v47 }
  0x58   : > { %646 = vmatpush.bf16.msra.mxu2 %v949_v13 }
  0x59   : > { %401 = vmatmul.bf16.vlgmr.msra.gmra.mxu0 %v290_v48  ;;  %659 = vmatpush.bf16.msra.mxu3 %v957_v14 }
  0x5a   : > { %414 = vmatmul.bf16.vlgmr.msra.gmra.mxu1 %v290_v48 }
  0x5c   : > { %647 = vmatpush.bf16.msra.mxu2 %v948_v23 }
  0x5d   : > { %660 = vmatpush.bf16.msra.mxu3 %v956_v24 }
  0x60   : > { %648 = vmatpush.bf16.msra.mxu2 %v947_v31 }
  0x61   : > { %661 = vmatpush.bf16.msra.mxu3 %v955_v32 }
  0xd6   : > { %v402_v58 = vpop.f32.mrf.mxu0 }
  0xd7   : > { %v1408_v59 = vadd.f32 %v402_v58, %v309_v54  ;;  %v415_v60 = vpop.f32.mrf.mxu1 }
  0xd8   : > { %v1410_v61 = vadd.f32 %v415_v60, %v310_v55 }
  0xd9   : > { %v1413_v0 = vmul.f32 0.70710677, %v1408_v59 }
  0xda   : > { %v1416_v1 = vmul.f32 0.70710677, %v1410_v61 }
  0xdb   : > { %v423_v2 = vmul.f32 %v1413_v0, %v1413_v0 }
  0xdc   : > { %v463_v3 = vmul.f32 %v1416_v1, %v1416_v1 }
  0xdd   : > { %v424_v6 = vmin.f32 %v423_v2, 16.0 }
  0xde   : > { %v464_v7 = vmin.f32 %v463_v3, 16.0  ;;  %v404_v8 = vpop.f32.mrf.mxu0 }
  0xdf   : > { %v425_v9 = vmul.f32 2.1237322e-06, %v424_v6  ;;  %v417_v10 = vpop.f32.mrf.mxu1  ;;  %v436_v11 = vmul.f32 3.8918573e-05, %v424_v6 }
  0xe0   : > { %v465_v12 = vmul.f32 2.1237322e-06, %v464_v7  ;;  %v476_v15 = vmul.f32 3.8918573e-05, %v464_v7 }
  0xe1   : > { %v426_v16 = vadd.f32 0.00028619796, %v425_v9  ;;  %v437_v17 = vadd.f32 0.001143296, %v436_v11 }
  0xe2   : > { %v466_v18 = vadd.f32 0.00028619796, %v465_v12  ;;  %v477_v19 = vadd.f32 0.001143296, %v476_v15 }
  0xe3   : > { %v427_v20 = vmul.f32 %v426_v16, %v424_v6  ;;  %v438_v21 = vmul.f32 %v437_v17, %v424_v6 }
  0xe4   : > { %v467_v22 = vmul.f32 %v466_v18, %v464_v7  ;;  %v478_v25 = vmul.f32 %v477_v19, %v464_v7 }
  0xe5   : > { %v428_v26 = vadd.f32 0.0036580483, %v427_v20  ;;  %v439_v27 = vadd.f32 0.014752088, %v438_v21 }
  0xe6   : > { %v479_v28 = vadd.f32 0.014752088, %v478_v25  ;;  %v468_v29 = vadd.f32 0.0036580483, %v467_v22  ;;  %v419_v22 = vmul.f32 0.5, %v1408_v59 }
  0xe7   : > { %v440_v30 = vmul.f32 %v439_v27, %v424_v6  ;;  %v429_v34 = vmul.f32 %v428_v26, %v424_v6 }
  0xe8   : > { %v480_v33 = vmul.f32 %v479_v28, %v464_v7  ;;  %v469_v37 = vmul.f32 %v468_v29, %v464_v7  ;;  %v1044_v28 = vld [vmem:[%s1467_s4] ss:$0 sm:$0xff] }
  0xe9   : > { %v441_v35 = vadd.f32 0.112945676, %v440_v30  ;;  %v430_v40 = vadd.f32 0.05243302, %v429_v34 }
  0xea   : > { %v481_v36 = vadd.f32 0.112945676, %v480_v33  ;;  %v470_v43 = vadd.f32 0.05243302, %v469_v37 }
  0xeb   : > { %v442_v38 = vmul.f32 %v441_v35, %v424_v6  ;;  %v431_v46 = vmul.f32 %v430_v40, %v424_v6 }
  0xec   : > { %v482_v39 = vmul.f32 %v481_v36, %v464_v7  ;;  %v471_v49 = vmul.f32 %v470_v43, %v464_v7 }
  0xed   : > { %v443_v41 = vadd.f32 0.4994258, %v442_v38  ;;  %v432_v50 = vadd.f32 0.18741608, %v431_v46 }
  0xee   : > { %v483_v42 = vadd.f32 0.4994258, %v482_v39  ;;  %v472_v51 = vadd.f32 0.18741608, %v471_v49 }
  0xef   : > { %v444_v44 = vmul.f32 %v443_v41, %v424_v6  ;;  %v433_v53 = vmul.f32 %v432_v50, %v424_v6 }
  0xf0   : > { %v484_v45 = vmul.f32 %v483_v42, %v464_v7  ;;  %v473_v56 = vmul.f32 %v472_v51, %v464_v7 }
  0xf1   : > { %v445_v47 = vadd.f32 1.0, %v444_v44  ;;  %v434_v60 = vadd.f32 1.1283791, %v433_v53 }
  0xf2   : > { %v485_v48 = vadd.f32 1.0, %v484_v45  ;;  %v474_v5 = vadd.f32 1.1283791, %v473_v56 }
  0xf3   : > { %1045 = vrcp.f32 %v445_v47  ;;  %v457_v62 = vand.u32 2147483648, %v445_v47  ;;  %v455_v3 = vand.u32 2147483647, %v445_v47  ;;  %vm451_vm2 = vweird.f32 %v445_v47 }
  0xf4   : > { %1047 = vrcp.f32 %v485_v48  ;;  %v497_v4 = vand.u32 2147483648, %v485_v48  ;;  %v495_v9 = vand.u32 2147483647, %v485_v48  ;;  %vm491_vm4 = vweird.f32 %v485_v48 }
  0xf5   : > { %v458_v6 = vor.u32 1.1754944e-38, %v457_v62  ;;  %v435_v7 = vmul.f32 %v434_v60, %v1413_v0  ;;  %vm456_vm5 = vcmp.eq.f32.partialorder %v455_v3, 8.507059e+37  ;;  %v475_v14 = vmul.f32 %v474_v5, %v1416_v1 }
  0xf6   : > { %v498_v13 = vor.u32 1.1754944e-38, %v497_v4  ;;  %vm496_vm7 = vcmp.eq.f32.partialorder %v495_v9, 8.507059e+37  ;;  %v420_v0 = vmul.f32 0.5, %v1410_v61 }
  0xf9   : > { %v1046_v52 = vpop.eup %1045 }
  0xfa   : > { %v1048_v54 = vpop.eup %1047  ;;  %v447_v55 = vmul.f32 %v1046_v52, %v445_v47  ;;  %vm452_vm0 = vweird.f32 %v1046_v52 }
  0xfb   : > { %v487_v57 = vmul.f32 %v1048_v54, %v485_v48  ;;  %vm492_vm1 = vweird.f32 %v1048_v54  ;;  %vm453_vm3 = vmor %vm451_vm2, %vm452_vm0 }
  0xfc   : > { %v448_v58 = vsub.f32 1.0, %v447_v55  ;;  %vm493_vm6 = vmor %vm491_vm4, %vm492_vm1 }
  0xfd   : > { %v488_v63 = vsub.f32 1.0, %v487_v57 }
  0xfe   : > { %v449_v2 = vmul.f32 %v1046_v52, %v448_v58 }
  0xff   : > { %v489_v8 = vmul.f32 %v1048_v54, %v488_v63 }
 0x100   : > { %v450_v10 = vadd.f32 %v1046_v52, %v449_v2 }
 0x101   : > { %v490_v11 = vadd.f32 %v1048_v54, %v489_v8 }
 0x102   : > { %v454_v12 = vsel %vm453_vm3, %v1046_v52, %v450_v10 }
 0x103   : > { %v459_v15 = vsel %vm456_vm5, %v458_v6, %v454_v12  ;;  %v494_v16 = vsel %vm493_vm6, %v1048_v54, %v490_v11 }
 0x104   : > { %v460_v17 = vmul.f32 %v459_v15, %v435_v7  ;;  %v499_v18 = vsel %vm496_vm7, %v498_v13, %v494_v16 }
 0x105   : > { %v500_v19 = vmul.f32 %v499_v18, %v475_v14 }
 0x106   : > { %v861_v20 = vclamps-f32 %v460_v17, 1.0 }
 0x107   : > { %v862_v21 = vclamps-f32 %v500_v19, 1.0 }
 0x108   : > { %v503_v23 = vadd.f32 1.0, %v861_v20 }
 0x109   : > { %v504_v24 = vadd.f32 1.0, %v862_v21 }
 0x10a   : > { %v505_v25 = vmul.f32 %v503_v23, %v419_v22 }
 0x10b   : > { %v506_v26 = vmul.f32 %v504_v24, %v420_v0 }
 0x10c   : > { %v507_v27 = vpack.c.bf16 %v505_v25, %v505_v25 }
 0x10d   : > { %v508_v1 = vpack.c.bf16 %v506_v26, %v506_v26 }
 0x10e   : > { %649 = vmatmul.bf16.vlgmr.msra.gmra.mxu2 %v507_v27 }
 0x10f   : > { %662 = vmatmul.bf16.vlgmr.msra.gmra.mxu3 %v508_v1 }
 0x191   : > { %v650_v59 = vpop.f32.mrf.mxu2 }
 0x192   : > { %v651_v61 = vadd.f32 %v1044_v28, %v650_v59  ;;  %v663_v29 = vpop.f32.mrf.mxu3 }
 0x194   : > { %v664_v30 = vadd.f32 %v663_v29, %v651_v61 }
 0x196   : > { %667 = vst [vmem:[%s289_s27] sm:$0xff] %v664_v30 }
 0x197   : > { %1196 = shalt.err (!%p1193_p9)
}
 0x198   : > { %977 = dma.vmem_to_hbm [thread:$0]  (%p1358_p13), %s682_s10, 128, %s684_s9, %s669_s25  }
 0x199   : > { %v652_v31 = vpop.f32.mrf.mxu2 }
 0x19a   : > { %v665_v32 = vpop.f32.mrf.mxu3 }
 0x19b PF: > { %s695_s7 = sand.u32 1, %s1231_s18   ;;  %p1475_p10 = scmp.ge.s32.totalorder %s1243_s21, 2 }
 0x19c   : > { %s696_s14 = scalar_lea.sflag [#allocation4], %s695_s7 }
 0x19d   : > { %p994_p11 = pnand %p1475_p10, %p1363_p4 }
 0x19f   : > { %p995_p0 = pneg %p994_p11 }
 0x1a1   : > { %1226 = dma.done.wait (%p995_p0), %s696_s14, 128  }
 0x1a2   : > { %1228 = vsyncadd (%p995_p0), %s696_s14, 4294967168  ;;  %p20_p13 = scmp.ge.s32.totalorder %s1338_s24, 4   ;;  %s1476_s18 = smov %s1235_s19 }
 0x1a3   : > { %s1477_s19 = smov %s1239_s20  ;;  %s1478_s20 = smov %s1350_s29 }
 0x1a4   : > { %s1479_s21 = smov %s1338_s24  ;;  %22 = sbr.rel (!%p20_p13) target bundleno = 7 (0x7), region = 97 }
 0x1a9   :  { %702 = vsyncpa [#allocation3], 1 }
 0x1aa   :  { %704 = vsyncpa [#allocation3 + $0x1], 1 }
 0x1ab   :  { %705 = vsyncpa [#allocation6], 1 }
 0x1ac   :  { %706 = vsyncpa [#allocation9], 1 }
 0x1ad   :  { %707 = vsyncpa [#allocation4], 1 }
 0x1ae   :  { %709 = vsyncpa [#allocation4 + $0x1], 1 }

</bundles_post_ra>
